<compile_context>
chip_gen: v7x
topology: tpu7x:2x2x1
jax: 0.10.0
libtpu: 0.0.40
codegen_flags: <defaults>
</compile_context>

<pallas_src>
import functools

import jax
import jax.numpy as jnp
from jax.experimental import pallas as pl
from jax.experimental.pallas import tpu as pltpu

P_DROP = 0.4
BN_EPS = 1e-5

_VMEM = pl.BlockSpec(memory_space=pltpu.MemorySpace.VMEM)


def _fused_mlp_kernel(n_hidden, *refs):
    """Fused (Linear -> Dropout -> BatchNorm1d(train) -> ReLU)*n_hidden -> Linear.

    refs layout:
      refs[0]                      : x            (B, F_in)
      per hidden layer (5 refs)    : W (F_in,F_out), b (1,F_out),
                                     gamma (1,F_out), beta (1,F_out),
                                     dropout mask (B,F_out) holding 0 or 1/(1-p)
      last two input refs          : W_last (F,outputs), b_last (1,outputs)
      refs[-1]                     : output       (B, outputs)
    """
    x_ref = refs[0]
    o_ref = refs[-1]

    h = x_ref[...]
    idx = 1
    for _ in range(n_hidden):
        w_ref, b_ref, g_ref, beta_ref, mask_ref = refs[idx:idx + 5]
        idx += 5

        # --- Linear (MXU), f32 accumulate.
        h = jnp.dot(h, w_ref[...], preferred_element_type=jnp.float32) + b_ref[...]

        # --- Dropout(0.4), training mode. Mask already contains 0 or 1/(1-p),
        #     so this is a single VPU multiply (no select, no extra rescale).
        h = h * mask_ref[...]

        # --- BatchNorm1d, training mode: biased batch stats over axis 0.
        mean = jnp.mean(h, axis=0, keepdims=True)
        d = h - mean                              # reused for var AND normalize
        var = jnp.mean(d * d, axis=0, keepdims=True)
        h = d * jax.lax.rsqrt(var + BN_EPS)
        h = h * g_ref[...] + beta_ref[...]

        # --- ReLU
        h = jnp.maximum(h, 0.0)

    w_ref, b_ref = refs[idx], refs[idx + 1]
    o_ref[...] = jnp.dot(h, w_ref[...], preferred_element_type=jnp.float32) + b_ref[...]


def simple_classifier_forward(x, hidden_params, last_params, dropout_key):
    """Single fused pallas_call for the whole network (all tensors are tiny,
    everything lives whole-array in VMEM; no grid needed)."""
    batch = x.shape[0]
    n_hidden = len(hidden_params)

    inputs = [x.astype(jnp.float32)]
    keys = jax.random.split(dropout_key, n_hidden) if n_hidden > 0 else []
    for (w, b, gamma, beta), k in zip(hidden_params, keys):
        f_out = w.shape[1]
        keep = jax.random.bernoulli(k, 1.0 - P_DROP, (batch, f_out))
        mask = keep.astype(jnp.float32) * (1.0 / (1.0 - P_DROP))
        inputs += [w, b.reshape(1, -1), gamma.reshape(1, -1),
                   beta.reshape(1, -1), mask]

    w_last, b_last = last_params
    inputs += [w_last, b_last.reshape(1, -1)]

    out_shape = jax.ShapeDtypeStruct((batch, w_last.shape[1]), jnp.float32)
    return pl.pallas_call(
        functools.partial(_fused_mlp_kernel, n_hidden),
        out_shape=out_shape,
        in_specs=[_VMEM] * len(inputs),
        out_specs=_VMEM,
    )(*inputs)


def init_params(key, inputs_list, neurons_list, outputs):
    """Deterministic params mimicking torch Linear init (U[-1/sqrt(fan_in), ..]).
    Weights are stored (F_in, F_out) — transposed vs. torch."""
    params = []
    for f_in, f_out in zip(inputs_list, neurons_list):
        key, kw, kb = jax.random.split(key, 3)
        bound = 1.0 / jnp.sqrt(jnp.float32(f_in))
        w = jax.random.uniform(kw, (f_in, f_out), jnp.float32, -bound, bound)
        b = jax.random.uniform(kb, (f_out,), jnp.float32, -bound, bound)
        gamma = jnp.ones((f_out,), jnp.float32)   # BatchNorm1d default weight
        beta = jnp.zeros((f_out,), jnp.float32)   # BatchNorm1d default bias
        params.append((w, b, gamma, beta))
    key, kw, kb = jax.random.split(key, 3)
    f_in = neurons_list[-1]
    bound = 1.0 / jnp.sqrt(jnp.float32(f_in))
    w_last = jax.random.uniform(kw, (f_in, outputs), jnp.float32, -bound, bound)
    b_last = jax.random.uniform(kb, (outputs,), jnp.float32, -bound, bound)
    return params, (w_last, b_last)


if __name__ == "__main__":
    # Small shapes consistent with SimpleClassifier(inputsList, neuronsList, outputs)
    inputs_list = [32, 64]
    neurons_list = [64, 48]
    outputs = 16
    batch = 8

    key = jax.random.PRNGKey(0)
    key, kx, kdrop = jax.random.split(key, 3)
    x = jax.random.normal(kx, (batch, inputs_list[0]), jnp.float32)

    hidden_params, last_params = init_params(key, inputs_list, neurons_list, outputs)

    y = simple_classifier_forward(x, hidden_params, last_params, kdrop)
    jax.block_until_ready(y)
    assert y.shape == (batch, outputs), y.shape
    assert bool(jnp.all(jnp.isfinite(y)))
    print("KERNEL_OK")
</pallas_src>

<mosaic_0001>
module attributes {stable_mosaic.version = 11 : i64} {
  func.func @_fused_mlp_kernel(%arg0: memref<8x32xf32, #tpu.memory_space<vmem>>, %arg1: memref<32x64xf32, #tpu.memory_space<vmem>>, %arg2: memref<1x64xf32, #tpu.memory_space<vmem>>, %arg3: memref<1x64xf32, #tpu.memory_space<vmem>>, %arg4: memref<1x64xf32, #tpu.memory_space<vmem>>, %arg5: memref<8x64xf32, #tpu.memory_space<vmem>>, %arg6: memref<64x48xf32, #tpu.memory_space<vmem>>, %arg7: memref<1x48xf32, #tpu.memory_space<vmem>>, %arg8: memref<1x48xf32, #tpu.memory_space<vmem>>, %arg9: memref<1x48xf32, #tpu.memory_space<vmem>>, %arg10: memref<8x48xf32, #tpu.memory_space<vmem>>, %arg11: memref<48x16xf32, #tpu.memory_space<vmem>>, %arg12: memref<1x16xf32, #tpu.memory_space<vmem>>, %arg13: memref<8x16xf32, #tpu.memory_space<vmem>>) attributes {dimension_semantics = [], scalar_prefetch = 0 : i64, scratch_operands = 0 : i64, tpu.core_type = #tpu.core_type<tc>} {
    %c0 = arith.constant 0 : index
    %c0_0 = arith.constant 0 : index
    %0 = vector.load %arg0[%c0, %c0_0] : memref<8x32xf32, #tpu.memory_space<vmem>>, vector<8x32xf32>
    %c0_1 = arith.constant 0 : index
    %c0_2 = arith.constant 0 : index
    %1 = vector.load %arg1[%c0_1, %c0_2] : memref<32x64xf32, #tpu.memory_space<vmem>>, vector<32x64xf32>
    %cst = arith.constant dense<0.000000e+00> : vector<8x64xf32>
    %2 = tpu.matmul %0, %1, %cst {dimension_numbers = #tpu.dot_dimension_numbers<[1], [0], [0], [1], [0, 0, 1, 1], [], []>} : vector<8x32xf32>, vector<32x64xf32>, vector<8x64xf32> -> vector<8x64xf32>
    %c0_3 = arith.constant 0 : index
    %c0_4 = arith.constant 0 : index
    %3 = vector.load %arg2[%c0_3, %c0_4] : memref<1x64xf32, #tpu.memory_space<vmem>>, vector<1x64xf32>
    %4 = vector.broadcast %3 : vector<1x64xf32> to vector<8x64xf32>
    %5 = arith.addf %2, %4 : vector<8x64xf32>
    %c0_5 = arith.constant 0 : index
    %c0_6 = arith.constant 0 : index
    %6 = vector.load %arg5[%c0_5, %c0_6] : memref<8x64xf32, #tpu.memory_space<vmem>>, vector<8x64xf32>
    %7 = arith.mulf %5, %6 : vector<8x64xf32>
    %cst_7 = arith.constant dense<0.000000e+00> : vector<64xf32>
    %8 = vector.multi_reduction <add>, %7, %cst_7 [0] : vector<8x64xf32> to vector<64xf32>
    %9 = vector.shape_cast %8 : vector<64xf32> to vector<1x64xf32>
    %cst_8 = arith.constant 8.000000e+00 : f32
    %10 = vector.broadcast %cst_8 : f32 to vector<1x64xf32>
    %11 = arith.divf %9, %10 : vector<1x64xf32>
    %12 = vector.broadcast %11 : vector<1x64xf32> to vector<8x64xf32>
    %13 = arith.subf %7, %12 : vector<8x64xf32>
    %14 = arith.mulf %13, %13 : vector<8x64xf32>
    %cst_9 = arith.constant dense<0.000000e+00> : vector<64xf32>
    %15 = vector.multi_reduction <add>, %14, %cst_9 [0] : vector<8x64xf32> to vector<64xf32>
    %16 = vector.shape_cast %15 : vector<64xf32> to vector<1x64xf32>
    %cst_10 = arith.constant 8.000000e+00 : f32
    %17 = vector.broadcast %cst_10 : f32 to vector<1x64xf32>
    %18 = arith.divf %16, %17 : vector<1x64xf32>
    %cst_11 = arith.constant 9.99999974E-6 : f32
    %19 = vector.broadcast %cst_11 : f32 to vector<1x64xf32>
    %20 = arith.addf %18, %19 : vector<1x64xf32>
    %21 = math.rsqrt %20 : vector<1x64xf32>
    %22 = vector.broadcast %21 : vector<1x64xf32> to vector<8x64xf32>
    %23 = arith.mulf %13, %22 : vector<8x64xf32>
    %c0_12 = arith.constant 0 : index
    %c0_13 = arith.constant 0 : index
    %24 = vector.load %arg3[%c0_12, %c0_13] : memref<1x64xf32, #tpu.memory_space<vmem>>, vector<1x64xf32>
    %25 = vector.broadcast %24 : vector<1x64xf32> to vector<8x64xf32>
    %26 = arith.mulf %23, %25 : vector<8x64xf32>
    %c0_14 = arith.constant 0 : index
    %c0_15 = arith.constant 0 : index
    %27 = vector.load %arg4[%c0_14, %c0_15] : memref<1x64xf32, #tpu.memory_space<vmem>>, vector<1x64xf32>
    %28 = vector.broadcast %27 : vector<1x64xf32> to vector<8x64xf32>
    %29 = arith.addf %26, %28 : vector<8x64xf32>
    %cst_16 = arith.constant 0.000000e+00 : f32
    %30 = vector.broadcast %cst_16 : f32 to vector<8x64xf32>
    %31 = arith.maximumf %29, %30 : vector<8x64xf32>
    %c0_17 = arith.constant 0 : index
    %c0_18 = arith.constant 0 : index
    %32 = vector.load %arg6[%c0_17, %c0_18] : memref<64x48xf32, #tpu.memory_space<vmem>>, vector<64x48xf32>
    %cst_19 = arith.constant dense<0.000000e+00> : vector<8x48xf32>
    %33 = tpu.matmul %31, %32, %cst_19 {dimension_numbers = #tpu.dot_dimension_numbers<[1], [0], [0], [1], [0, 0, 1, 1], [], []>} : vector<8x64xf32>, vector<64x48xf32>, vector<8x48xf32> -> vector<8x48xf32>
    %c0_20 = arith.constant 0 : index
    %c0_21 = arith.constant 0 : index
    %34 = vector.load %arg7[%c0_20, %c0_21] : memref<1x48xf32, #tpu.memory_space<vmem>>, vector<1x48xf32>
    %35 = vector.broadcast %34 : vector<1x48xf32> to vector<8x48xf32>
    %36 = arith.addf %33, %35 : vector<8x48xf32>
    %c0_22 = arith.constant 0 : index
    %c0_23 = arith.constant 0 : index
    %37 = vector.load %arg10[%c0_22, %c0_23] : memref<8x48xf32, #tpu.memory_space<vmem>>, vector<8x48xf32>
    %38 = arith.mulf %36, %37 : vector<8x48xf32>
    %cst_24 = arith.constant dense<0.000000e+00> : vector<48xf32>
    %39 = vector.multi_reduction <add>, %38, %cst_24 [0] : vector<8x48xf32> to vector<48xf32>
    %40 = vector.shape_cast %39 : vector<48xf32> to vector<1x48xf32>
    %cst_25 = arith.constant 8.000000e+00 : f32
    %41 = vector.broadcast %cst_25 : f32 to vector<1x48xf32>
    %42 = arith.divf %40, %41 : vector<1x48xf32>
    %43 = vector.broadcast %42 : vector<1x48xf32> to vector<8x48xf32>
    %44 = arith.subf %38, %43 : vector<8x48xf32>
    %45 = arith.mulf %44, %44 : vector<8x48xf32>
    %cst_26 = arith.constant dense<0.000000e+00> : vector<48xf32>
    %46 = vector.multi_reduction <add>, %45, %cst_26 [0] : vector<8x48xf32> to vector<48xf32>
    %47 = vector.shape_cast %46 : vector<48xf32> to vector<1x48xf32>
    %cst_27 = arith.constant 8.000000e+00 : f32
    %48 = vector.broadcast %cst_27 : f32 to vector<1x48xf32>
    %49 = arith.divf %47, %48 : vector<1x48xf32>
    %cst_28 = arith.constant 9.99999974E-6 : f32
    %50 = vector.broadcast %cst_28 : f32 to vector<1x48xf32>
    %51 = arith.addf %49, %50 : vector<1x48xf32>
    %52 = math.rsqrt %51 : vector<1x48xf32>
    %53 = vector.broadcast %52 : vector<1x48xf32> to vector<8x48xf32>
    %54 = arith.mulf %44, %53 : vector<8x48xf32>
    %c0_29 = arith.constant 0 : index
    %c0_30 = arith.constant 0 : index
    %55 = vector.load %arg8[%c0_29, %c0_30] : memref<1x48xf32, #tpu.memory_space<vmem>>, vector<1x48xf32>
    %56 = vector.broadcast %55 : vector<1x48xf32> to vector<8x48xf32>
    %57 = arith.mulf %54, %56 : vector<8x48xf32>
    %c0_31 = arith.constant 0 : index
    %c0_32 = arith.constant 0 : index
    %58 = vector.load %arg9[%c0_31, %c0_32] : memref<1x48xf32, #tpu.memory_space<vmem>>, vector<1x48xf32>
    %59 = vector.broadcast %58 : vector<1x48xf32> to vector<8x48xf32>
    %60 = arith.addf %57, %59 : vector<8x48xf32>
    %cst_33 = arith.constant 0.000000e+00 : f32
    %61 = vector.broadcast %cst_33 : f32 to vector<8x48xf32>
    %62 = arith.maximumf %60, %61 : vector<8x48xf32>
    %c0_34 = arith.constant 0 : index
    %c0_35 = arith.constant 0 : index
    %63 = vector.load %arg11[%c0_34, %c0_35] : memref<48x16xf32, #tpu.memory_space<vmem>>, vector<48x16xf32>
    %cst_36 = arith.constant dense<0.000000e+00> : vector<8x16xf32>
    %64 = tpu.matmul %62, %63, %cst_36 {dimension_numbers = #tpu.dot_dimension_numbers<[1], [0], [0], [1], [0, 0, 1, 1], [], []>} : vector<8x48xf32>, vector<48x16xf32>, vector<8x16xf32> -> vector<8x16xf32>
    %c0_37 = arith.constant 0 : index
    %c0_38 = arith.constant 0 : index
    %65 = vector.load %arg12[%c0_37, %c0_38] : memref<1x16xf32, #tpu.memory_space<vmem>>, vector<1x16xf32>
    %66 = vector.broadcast %65 : vector<1x16xf32> to vector<8x16xf32>
    %67 = arith.addf %64, %66 : vector<8x16xf32>
    %c0_39 = arith.constant 0 : index
    %c0_40 = arith.constant 0 : index
    %68 = vector.load %arg13[%c0_39, %c0_40] : memref<8x16xf32, #tpu.memory_space<vmem>>, vector<8x16xf32>
    tpu.vector_store %arg13[%c0_39, %c0_40], %67 {strides = array<i32>} : memref<8x16xf32, #tpu.memory_space<vmem>>, vector<8x16xf32>,
    return
  }
}

</mosaic_0001>

<bundles_post_ra>
// kernel: tpu_custom_call.1
= control target key start
LH: loop header
LB: loop body
LE: loop exit
PB: predicated region body
PF: predicated region fallthrough
CT: control target
= control target key end

     0   :  { %v539_v3 = vmov 0.0|0.0   ;;  %vm540_vm0 = vmmov 0   ;;  %v541_v6 = vmov 0.0   ;;  %s724_s0 = inlined_call_operand.vmem [shape: f32[8,32], index: 0, kind: input, shape index: {}]   ;;  %s725_s1 = inlined_call_operand.vmem [shape: f32[32,64], index: 1, kind: input, shape index: {}]   ;;  %s726_s2 = inlined_call_operand.vmem [shape: f32[1,64], index: 2, kind: input, shape index: {}]   ;;  %s727_s3 = inlined_call_operand.vmem [shape: f32[1,64], index: 3, kind: input, shape index: {}]   ;;  %s728_s4 = inlined_call_operand.vmem [shape: f32[1,64], index: 4, kind: input, shape index: {}]   ;;  %s729_s5 = inlined_call_operand.vmem [shape: f32[8,64], index: 5, kind: input, shape index: {}]   ;;  %s730_s6 = inlined_call_operand.vmem [shape: f32[64,48], index: 6, kind: input, shape index: {}]   ;;  %s731_s7 = inlined_call_operand.vmem [shape: f32[1,48], index: 7, kind: input, shape index: {}]   ;;  %s732_s8 = inlined_call_operand.vmem [shape: f32[1,48], index: 8, kind: input, shape index: {}]   ;;  %s733_s9 = inlined_call_operand.vmem [shape: f32[1,48], index: 9, kind: input, shape index: {}]   ;;  %s734_s10 = inlined_call_operand.vmem [shape: f32[8,48], index: 10, kind: input, shape index: {}]   ;;  %s735_s11 = inlined_call_operand.vmem [shape: f32[48,16], index: 11, kind: input, shape index: {}]   ;;  %s736_s12 = inlined_call_operand.vmem [shape: f32[1,16], index: 12, kind: input, shape index: {}]   ;;  %s737_s13 = inlined_call_operand.hbm [shape: f32[8,16], index: 13, kind: output, shape index: {}]  }
   0x1   :  { %v46_v0 = vld [vmem:[%s725_s1] sm:$0xff]  ;;  %v47_v1 = vld [vmem:[%s725_s1 + $0x8] sm:$0xff]  ;;  %v48_v2 = vld [vmem:[%s725_s1 + $0x10] sm:$0xff]  ;;  %480 = vmatprep.subr.bf16.mxu0 %v539_v3  ;;  %443 = vmatprep.mubr.msk.f32.mxu0 %vm540_vm0, %v541_v6 }
   0x2   :  { %v481_v4 = vpack.c.bf16 %v47_v1, %v46_v0  ;;  %v49_v5 = vld [vmem:[%s725_s1 + $0x18] sm:$0xff]  ;;  %486 = vmatprep.subr.bf16.mxu1 %v539_v3  ;;  %462 = vmatprep.mubr.msk.f32.mxu1 %vm540_vm0, %v541_v6 }
   0x3   :  { %18 = vsyncpa [#allocation3], 0  ;;  %v484_v7 = vpack.c.bf16 %v49_v5, %v48_v2  ;;  %v45_v8 = vld [vmem:[%s724_s0] sm:$0xff]  ;;  %vm57_vm1 = vcmask 261120   ;;  %v174_v10 = vld [vmem:[%s730_s6 + $0x8] sm:$0xff]  ;;  %vm133_vm2 = vcmask 523264  }
   0x4   :  { %482 = vmatpush3.bf16.msra.mxu0 %v481_v4  ;;  %v173_v9 = vld [vmem:[%s730_s6] sm:$0xff]  ;;  %v175_v11 = vld [vmem:[%s730_s6 + $0x10] sm:$0xff]  ;;  %v176_v13 = vld [vmem:[%s730_s6 + $0x18] sm:$0xff]  ;;  %vm263_vm3 = vcmask 392192   ;;  %s542_s1 = smov [#allocation2]   ;;  %vm388_vm4 = vcmask 130048  }
   0x5   :  { %483 = vmatprep.subr.bf16.mxu0 %v539_v3  ;;  %v487_v12 = vpack.c.bf16 %v174_v10, %v173_v9  ;;  %v490_v14 = vpack.c.bf16 %v176_v13, %v175_v11  ;;  %v177_v15 = vld [vmem:[%s730_s6 + $0x20] sm:$0xff]  ;;  %v178_v16 = vld [vmem:[%s730_s6 + $0x28] sm:$0xff]  ;;  %v179_v18 = vld [vmem:[%s730_s6 + $0x30] sm:$0xff] }
   0x6   :  { %v493_v17 = vpack.c.bf16 %v178_v16, %v177_v15  ;;  %v180_v19 = vld [vmem:[%s730_s6 + $0x38] sm:$0xff]  ;;  %v404_v21 = vld [vmem:[%s726_s2] ss:$0 sm:$0xff]  ;;  %v303_v54 = vld [vmem:[%s735_s11 + $0x8] sm:$0xff]  ;;  %s396_s2 = sshll.u32 %s542_s1, 4  ;;  %s397_s2 = int_to_ptr.vmem [resolvable:$true] %s396_s2 }
   0x7   :  { %488 = vmatpush3.bf16.msra.mxu1 %v487_v12  ;;  %v496_v20 = vpack.c.bf16 %v180_v19, %v179_v18  ;;  %v131_v23 = vld [vmem:[%s729_s5] sm:$0xff]  ;;  %v304_v56 = vld [vmem:[%s735_s11 + $0x10] sm:$0xff]  ;;  %v305_v57 = vld [vmem:[%s735_s11 + $0x18] sm:$0xff]  ;;  %p520_p1 = scmp.lt.s32.totalorder %s397_s2, %s397_s2 }
   0x8   :  { %485 = vmatpush3.bf16.msra.mxu0 %v484_v7  ;;  %489 = vmatprep.subr.bf16.mxu1 %v539_v3  ;;  %v406_v47 = vld [vmem:[%s727_s3] ss:$0 sm:$0xff]  ;;  %v502_v58 = vpack.c.bf16 %v305_v57, %v304_v56  ;;  %v307_v60 = vld [vmem:[%s735_s11 + $0x28] sm:$0xff] }
   0x9   :  { %498 = vmatprep.subr.bf16.mxu0 %v539_v3  ;;  %v407_v49 = vld [vmem:[%s728_s4] ss:$0 sm:$0xff] }
   0xa   :  { %v302_v53 = vld [vmem:[%s735_s11] sm:$0xff] }
   0xb   :  { %444 = vmatmul.mubr.msk.f32.vlgmr.msra.gmra.mrb[0].mxu0 %vm57_vm1, %v45_v8  ;;  %491 = vmatpush3.bf16.msra.mxu1 %v490_v14  ;;  %v499_v55 = vpack.c.bf16 %v303_v54, %v302_v53  ;;  %v306_v59 = vld [vmem:[%s735_s11 + $0x20] sm:$0xff] }
   0xc   :  { %477 = vmatprep.mubr.msk.f32.mxu0 %vm540_vm0, %v541_v6  ;;  %492 = vmatprep.subr.bf16.mxu1 %v539_v3  ;;  %v505_v61 = vpack.c.bf16 %v307_v60, %v306_v59  ;;  %v408_v62 = vld [vmem:[%s731_s7] ss:$0 sm:$0xff] }
   0xd   :  { %500 = vmatpush3.bf16.msra.mxu0 %v499_v55  ;;  %v261_v0 = vld [vmem:[%s734_s10] sm:$0xff] }
   0xe   :  { %501 = vmatprep.subr.bf16.mxu0 %v539_v3 }
   0xf   :  { %494 = vmatpush3.bf16.msra.mxu1 %v493_v17 }
  0x10   :  { %495 = vmatprep.subr.bf16.mxu1 %v539_v3 }
  0x11   :  { %503 = vmatpush3.bf16.msra.mxu0 %v502_v58 }
  0x12   :  { %504 = vmatprep.subr.bf16.mxu0 %v539_v3 }
  0x13   :  { %497 = vmatpush3.bf16.msra.mxu1 %v496_v20 }
  0x15   :  { %506 = vmatpush3.bf16.msra.mxu0 %v505_v61 }
  0xde   :  { %v127_v22 = vpop.f32.mrb[0].mxu0 }
  0xdf   :  { %v128_v24 = vadd.f32 %v404_v21, %v127_v22  ;;  %v445_v25 = vpop.f32.mrb[1].mxu0 }
  0xe1   :  { %v132_v26 = vmul.f32 %v131_v23, %v128_v24  ;;  %v410_v24 = vld [vmem:[%s732_s8] ss:$0 sm:$0xff]  ;;  %s515_s8 = scalar_lea.vmem %s397_s2, 128 }
  0xe2   :  { %p516_p0 = scmp.ne.s32.totalorder %s397_s2, %s515_s8  ;;  %p521_p2 = scmp.lt.s32.totalorder %s515_s8, %s515_s8 }
  0xe3   :  { %v134_v27 = vsel %vm133_vm2, %v132_v26, 0.0 }
  0xe4   :  { %v135_v28 = vrot.slane %v134_v27, 4  ;;  %p522_p3 = por %p521_p2, %p520_p1 }
  0xe6   :  { %v136_v29 = vadd.f32 %v135_v28, %v134_v27  ;;  %p523_p4 = pnand %p522_p3, %p516_p0 }
  0xe8   :  { %v137_v30 = vrot.slane %v136_v29, 2 }
  0xea   :  { %v138_v31 = vadd.f32 %v137_v30, %v136_v29  ;;  %v412_v30 = vld [vmem:[%s736_s12] ss:$0 sm:$0xff] }
  0xec   :  { %v139_v32 = vrot.slane %v138_v31, 1 }
  0xee   :  { %v140_v33 = vadd.f32 %v139_v32, %v138_v31 }
  0xf0   :  { %v142_v34 = vmul.f32 0.125, %v140_v33 }
  0xf2   :  { %v143_v35 = vsub.f32 %v132_v26, %v142_v34  ;;  %v411_v26 = vld [vmem:[%s733_s9] ss:$0 sm:$0xff] }
  0xf4   :  { %v144_v36 = vmul.f32 %v143_v35, %v143_v35 }
  0xf6   :  { %v145_v37 = vsel %vm133_vm2, %v144_v36, 0.0 }
  0xf7   :  { %v146_v38 = vrot.slane %v145_v37, 4 }
  0xf9   :  { %v147_v39 = vadd.f32 %v146_v38, %v145_v37 }
  0xfb   :  { %v148_v40 = vrot.slane %v147_v39, 2 }
  0xfd   :  { %v149_v41 = vadd.f32 %v148_v40, %v147_v39 }
  0xff   :  { %v150_v42 = vrot.slane %v149_v41, 1 }
 0x101   :  { %v151_v43 = vadd.f32 %v150_v42, %v149_v41 }
 0x103   :  { %v152_v44 = vmul.f32 0.125, %v151_v43 }
 0x105   :  { %v153_v45 = vadd.f32 1e-05, %v152_v44 }
 0x107   :  { %511 = vrsqrt.f32 %v153_v45 }
 0x111   :  { %v512_v46 = vpop.eup %511 }
 0x112   :  { %v155_v48 = vmul.f32 %v512_v46, %v143_v35 }
 0x114   :  { %v163_v50 = vmul.f32 %v406_v47, %v155_v48 }
 0x116   :  { %v171_v51 = vadd.f32 %v407_v49, %v163_v50 }
 0x118   :  { %v172_v52 = vmax.f32 %v171_v51, 0.0 }
 0x11a   :  { %463 = vmatmul.mubr.msk.f32.vlgmr.msra.gmra.mrb[0].mxu1 %vm133_vm2, %v172_v52 }
 0x1ed   :  { %v257_v63 = vpop.f32.mrb[0].mxu1 }
 0x1ee   :  { %v258_v1 = vadd.f32 %v408_v62, %v257_v63  ;;  %v464_v2 = vpop.f32.mrb[1].mxu1 }
 0x1f0   :  { %v262_v3 = vmul.f32 %v261_v0, %v258_v1 }
 0x1f2   :  { %v264_v4 = vsel %vm263_vm3, %v262_v3, 0.0 }
 0x1f3   :  { %v265_v5 = vrot.slane %v264_v4, 4 }
 0x1f5   :  { %v266_v6 = vadd.f32 %v265_v5, %v264_v4 }
 0x1f7   :  { %v267_v7 = vrot.slane %v266_v6, 2 }
 0x1f9   :  { %v268_v8 = vadd.f32 %v267_v7, %v266_v6 }
 0x1fb   :  { %v269_v9 = vrot.slane %v268_v8, 1 }
 0x1fd   :  { %v270_v10 = vadd.f32 %v269_v9, %v268_v8 }
 0x1ff   :  { %v271_v11 = vmul.f32 0.125, %v270_v10 }
 0x201   :  { %v272_v12 = vsub.f32 %v262_v3, %v271_v11 }
 0x203   :  { %v273_v13 = vmul.f32 %v272_v12, %v272_v12 }
 0x205   :  { %v274_v14 = vsel %vm263_vm3, %v273_v13, 0.0 }
 0x206   :  { %v275_v15 = vrot.slane %v274_v14, 4 }
 0x208   :  { %v276_v16 = vadd.f32 %v275_v15, %v274_v14 }
 0x20a   :  { %v277_v17 = vrot.slane %v276_v16, 2 }
 0x20c   :  { %v278_v18 = vadd.f32 %v277_v17, %v276_v16 }
 0x20e   :  { %v279_v19 = vrot.slane %v278_v18, 1 }
 0x210   :  { %v280_v20 = vadd.f32 %v279_v19, %v278_v18 }
 0x212   :  { %v281_v21 = vmul.f32 0.125, %v280_v20 }
 0x214   :  { %v282_v22 = vadd.f32 1e-05, %v281_v21 }
 0x216   :  { %513 = vrsqrt.f32 %v282_v22 }
 0x220   :  { %v514_v23 = vpop.eup %513 }
 0x221   :  { %v284_v25 = vmul.f32 %v514_v23, %v272_v12 }
 0x223   :  { %v292_v27 = vmul.f32 %v410_v24, %v284_v25 }
 0x225   :  { %v300_v28 = vadd.f32 %v411_v26, %v292_v27 }
 0x227   :  { %v301_v29 = vmax.f32 %v300_v28, 0.0 }
 0x229   :  { %478 = vmatmul.mubr.msk.f32.vlgmr.msra.gmra.mrb[2].mxu0 %vm263_vm3, %v301_v29 }
 0x2fc   :  { %v384_v31 = vpop.f32.mrb[2].mxu0 }
 0x2fd   :  { %v385_v32 = vadd.f32 %v412_v30, %v384_v31  ;;  %v479_v33 = vpop.f32.mrb[3].mxu0 }
 0x2ff   :  { %389 = vst.msk [vmem:[#allocation2] sm:$0xff] %vm388_vm4, %v385_v32 }
 0x300   :  { %526 = shalt.err (!%p523_p4)
}
 0x301   :  { %s527_s6 = scalar_lea.hbm %s737_s13, 128 }
 0x302   :  { %p528_p5 = scmp.ne.s32.totalorder %s737_s13, %s527_s6  ;;  %p531_p6 = scmp.lt.u32.totalorder %s527_s6, %s737_s13 }
 0x304   :  { %p533_p7 = pnand %p531_p6, %p528_p5 }
 0x306   :  { %536 = shalt.err (!%p533_p7)
}
 0x307   :  { %399 = dma.vmem_to_hbm [thread:$0]  %s397_s2, 128, %s737_s13, [#allocation3]  }
 0x308   :  { %537 = dma.done.wait [#allocation3], 128  }
 0x309   :  { %538 = vsyncadd [#allocation3], 4294967168 }
 0x30a   :  { %403 = vsyncpa [#allocation3], 1 }

</bundles_post_ra>
